<compile_context>
chip_gen: v7x
topology: tpu7x:2x2x1
jax: 0.10.0
libtpu: 0.0.40
codegen_flags: <defaults>
</compile_context>

<pallas_src>
import math
import functools

import numpy as np
import jax
import jax.numpy as jnp
from jax import lax
from jax.experimental import pallas as pl
from jax.experimental.pallas import tpu as pltpu  # noqa: F401  (imported per convention)


def _duration_kernel(coef_ref, dconst_ref, o_ref, *, L, d_short, p_short, log_D):
    """Compute logp_d as one (K*C*2, D) slab.

    coef_ref   : (R, 4L+1), R = K*C*2, per-row packed fields
                 [a_0..a_{L-1}, b_0.., c_0.., pw_0..pw_L] with
                 a = shape-1, b = 1/scale, c = -shape*log(scale)-lgamma(shape),
                 pw = softmax mixture weights.  Rows 2i and 2i+1 carry the same
                 (k, c) coefficients so no sublane interleave is needed.
    dconst_ref : (3, D) rows: d (=1..D), log d, spike-component softmax probs.
    o_ref      : (R, D)  even rows: -log D (inactive), odd rows: gamma mixture.
    """
    R, D = o_ref.shape

    dval = dconst_ref[0:1, :]                      # (1, D)
    logd = dconst_ref[1:2, :]                      # (1, D)
    spike_p = dconst_ref[2:3, :]                   # (1, D) softmax of terminal spike
    fill = jnp.float32(p_short - log_D)
    short_mask = dval <= jnp.float32(d_short)      # (1, D), shared by all components

    def field(i):                                  # (R, 1) lane slice, broadcasts over D
        return coef_ref[:, i:i + 1]

    # Mixture accumulated in probability space: acc = sum_l pw_l * softmax_D(x_l),
    # out = log(acc).  Mathematically identical to logsumexp(logw + log_softmax);
    # each per-component softmax keeps its own max shift so it is stable, and the
    # weighted sum is <= 1 so there is no overflow.  (Only degenerate parameters
    # with within-component logit spreads > ~87 could underflow acc to 0.)
    acc = field(4 * L) * spike_p                   # terminal "mass at D" component
    for l in range(L):
        x = field(l) * logd - dval * field(L + l) + field(2 * L + l)   # (R, D)
        x = jnp.where(short_mask, fill, x)         # penalize short durations
        m = jnp.max(x, axis=-1, keepdims=True)     # (R, 1)
        e = jnp.exp(x - m)                         # (R, D) — one exp pass / component
        s = jnp.sum(e, axis=-1, keepdims=True)     # (R, 1)
        # approx=True would offload to a cheaper EUP recip, but its ~1e-3 relative
        # error breaks 1e-5 agreement with the float32 reference; keep exact.
        acc = acc + (field(3 * L + l) * pl.reciprocal(s, approx=False)) * e
    logp_d1 = jnp.log(acc)                         # single final log

    # Fuse the constant inactive plane on even sublanes; one full-block store.
    row = lax.broadcasted_iota(jnp.int32, (R, D), 0)
    o_ref[...] = jnp.where((row & 1) == 0, jnp.float32(-log_D), logp_d1)


@functools.partial(
    jax.jit,
    static_argnames=("D", "K", "L", "C", "shape_factor", "d_short", "p_short", "eps"))
def gamma_duration_forward(scale, shape, ratio, *, D, K, L, C, shape_factor,
                           d_short, p_short, eps):
    scale_factor = D / shape_factor
    log_D = math.log(D)
    fill = p_short - log_D

    # Tiny (K, L, C, 1) parameter prep (plain JAX glue, fused under jit).
    scale_p = scale_factor * jax.nn.softplus(scale) + eps          # gamma scale
    shape_p = shape_factor * jax.nn.softplus(shape) + eps          # gamma shape
    a = shape_p - 1.0
    b = 1.0 / scale_p
    # TODO(synk): lgamma has no guaranteed Mosaic lowering; it only touches the
    # tiny (K, L, C, 1) parameter tensor, so it is precomputed here and packed in.
    c = -shape_p * jnp.log(scale_p) - lax.lgamma(shape_p)
    pw = jax.nn.softmax(ratio, axis=1)                             # (K, L+1, C, 1)

    # Dense 2-D coefficient packing: (K*C, 4L+1) with fields on lanes, rows
    # repeated once per n plane -> (K*C*2, 4L+1).
    coef = jnp.concatenate([a, b, c, pw], axis=1)                  # (K, 4L+1, C, 1)
    coef = jnp.transpose(coef, (0, 2, 1, 3)).reshape(K * C, 4 * L + 1)
    coef = jnp.repeat(coef, 2, axis=0).astype(jnp.float32)         # (K*C*2, 4L+1)

    # Duration-axis constants are fully static (D, d_short, p_short) -> bake at
    # trace time instead of iota + jnp.log in-kernel.
    d_np = np.arange(1, D + 1, dtype=np.float32)
    spike_z = (D - 1) * math.exp(fill) + 1.0                       # spike softmax norm
    spike_np = np.full((D,), math.exp(fill) / spike_z, dtype=np.float32)
    spike_np[-1] = np.float32(1.0 / spike_z)
    dconst = jnp.asarray(np.stack([d_np, np.log(d_np), spike_np], axis=0))  # (3, D)

    kernel = functools.partial(_duration_kernel, L=L, d_short=int(d_short),
                               p_short=float(p_short), log_D=log_D)

    # Single gridless invocation: all inputs/outputs (a few KB) are VMEM-resident
    # and the result is one contiguous lane-dense slab.
    # TODO(synk): for production sizes (large D or K*C) block over K*C with a
    # BlockSpec grid + dimension_semantics=("parallel",) so both v7x TensorCores
    # are used and tiles stay within the 64 MiB VMEM budget.
    out = pl.pallas_call(
        kernel,
        out_shape=jax.ShapeDtypeStruct((K * C * 2, D), jnp.float32),
    )(coef, dconst)
    return out.reshape(K, C, 2, D)   # row-major identical -> effectively free


class GammaDurationPallas:
    """JAX/Pallas port of sed_hsmm.gamma_duration.GammaDuration (forward only)."""

    def __init__(self, D, K, L, C, shape_factor=5.0, d_short=3, p_short=-4,
                 eps=1e-6, key=None):
        self.D, self.K, self.L, self.C = D, K, L, C
        self.shape_factor = float(shape_factor)
        self.scale_factor = D / self.shape_factor
        self.log_D = math.log(D)
        self.d_short = int(d_short)
        self.p_short = float(p_short)
        self.eps = float(eps)

        key = jax.random.PRNGKey(0) if key is None else key
        k1, k2, k3 = jax.random.split(key, 3)
        # torch.rand -> U(0,1); torch.randn -> N(0,1)
        self.scale = jax.random.uniform(k1, (K, L, C, 1), jnp.float32)
        self.shape = jax.random.uniform(k2, (K, L, C, 1), jnp.float32)
        self.ratio = jax.random.normal(k3, (K, L + 1, C, 1), jnp.float32)

        self.d = jnp.arange(1, D + 1, dtype=jnp.float32)

    def forward(self):
        return gamma_duration_forward(
            self.scale, self.shape, self.ratio,
            D=self.D, K=self.K, L=self.L, C=self.C,
            shape_factor=self.shape_factor, d_short=self.d_short,
            p_short=self.p_short, eps=self.eps)

    # Pure-JAX mirror of the PyTorch forward, for verification.
    def reference_forward(self):
        scale_p = self.scale_factor * jax.nn.softplus(self.scale) + self.eps
        shape_p = self.shape_factor * jax.nn.softplus(self.shape) + self.eps
        d = self.d
        logp = ((shape_p - 1.0) * jnp.log(d)[None, None, None, :]
                - d[None, None, None, :] / scale_p
                - shape_p * jnp.log(scale_p)
                - lax.lgamma(shape_p))                                    # (K,L,C,D)
        logp = logp.at[..., :self.d_short].set(self.p_short - self.log_D)
        logp = jax.nn.log_softmax(logp, axis=-1)
        spike = jnp.full((self.K, 1, self.C, self.D),
                         self.p_short - self.log_D, jnp.float32)
        spike = spike.at[..., -1].set(0.0)
        spike = jax.nn.log_softmax(spike, axis=-1)
        logp_d1 = jnp.concatenate([logp, spike], axis=1)                  # (K,L+1,C,D)
        logp_d1 = jax.nn.logsumexp(
            jax.nn.log_softmax(self.ratio, axis=1) + logp_d1, axis=1)     # (K,C,D)
        logp_d0 = jnp.full((self.K, self.C, self.D), -self.log_D, jnp.float32)
        return jnp.stack([logp_d0, logp_d1], axis=2)                      # (K,C,2,D)


if __name__ == "__main__":
    D, K, L, C = 16, 4, 3, 5
    model = GammaDurationPallas(D=D, K=K, L=L, C=C, key=jax.random.PRNGKey(0))

    out = jax.block_until_ready(model.forward())
    assert out.shape == (K, C, 2, D), out.shape
    assert out.dtype == jnp.float32

    ref = jax.block_until_ready(model.reference_forward())
    assert jnp.allclose(out, ref, rtol=1e-5, atol=1e-5), float(jnp.max(jnp.abs(out - ref)))

    print("KERNEL_OK")
</pallas_src>

<mosaic_0001>
module attributes {stable_mosaic.version = 11 : i64} {
  func.func @_duration_kernel(%arg0: memref<40x13xf32, #tpu.memory_space<vmem>>, %arg1: memref<3x16xf32, #tpu.memory_space<vmem>>, %arg2: memref<40x16xf32, #tpu.memory_space<vmem>>) attributes {dimension_semantics = [], scalar_prefetch = 0 : i64, scratch_operands = 0 : i64, tpu.core_type = #tpu.core_type<tc>} {
    %c0 = arith.constant 0 : index
    %c0_0 = arith.constant 0 : index
    %0 = vector.load %arg1[%c0, %c0_0] : memref<3x16xf32, #tpu.memory_space<vmem>>, vector<1x16xf32>
    %c1 = arith.constant 1 : index
    %c0_1 = arith.constant 0 : index
    %1 = vector.load %arg1[%c1, %c0_1] : memref<3x16xf32, #tpu.memory_space<vmem>>, vector<1x16xf32>
    %c2 = arith.constant 2 : index
    %c0_2 = arith.constant 0 : index
    %2 = vector.load %arg1[%c2, %c0_2] : memref<3x16xf32, #tpu.memory_space<vmem>>, vector<1x16xf32>
    %cst = arith.constant 3.000000e+00 : f32
    %3 = vector.broadcast %cst : f32 to vector<1x16xf32>
    %4 = arith.cmpf ole, %0, %3 : vector<1x16xf32>
    %c0_3 = arith.constant 0 : index
    %c12 = arith.constant 12 : index
    %5 = vector.load %arg0[%c0_3, %c12] : memref<40x13xf32, #tpu.memory_space<vmem>>, vector<40x1xf32>
    %6 = vector.broadcast %5 : vector<40x1xf32> to vector<40x16xf32>
    %7 = vector.broadcast %2 : vector<1x16xf32> to vector<40x16xf32>
    %8 = arith.mulf %6, %7 : vector<40x16xf32>
    %c0_4 = arith.constant 0 : index
    %c0_5 = arith.constant 0 : index
    %9 = vector.load %arg0[%c0_4, %c0_5] : memref<40x13xf32, #tpu.memory_space<vmem>>, vector<40x1xf32>
    %10 = vector.broadcast %9 : vector<40x1xf32> to vector<40x16xf32>
    %11 = vector.broadcast %1 : vector<1x16xf32> to vector<40x16xf32>
    %12 = arith.mulf %10, %11 : vector<40x16xf32>
    %c0_6 = arith.constant 0 : index
    %c3 = arith.constant 3 : index
    %13 = vector.load %arg0[%c0_6, %c3] : memref<40x13xf32, #tpu.memory_space<vmem>>, vector<40x1xf32>
    %14 = vector.broadcast %0 : vector<1x16xf32> to vector<40x16xf32>
    %15 = vector.broadcast %13 : vector<40x1xf32> to vector<40x16xf32>
    %16 = arith.mulf %14, %15 : vector<40x16xf32>
    %17 = arith.subf %12, %16 : vector<40x16xf32>
    %c0_7 = arith.constant 0 : index
    %c6 = arith.constant 6 : index
    %18 = vector.load %arg0[%c0_7, %c6] : memref<40x13xf32, #tpu.memory_space<vmem>>, vector<40x1xf32>
    %19 = vector.broadcast %18 : vector<40x1xf32> to vector<40x16xf32>
    %20 = arith.addf %17, %19 : vector<40x16xf32>
    %cst_8 = arith.constant -6.77258873 : f32
    %21 = vector.shape_cast %4 : vector<1x16xi1> to vector<1x16xi1>
    %22 = vector.broadcast %21 : vector<1x16xi1> to vector<40x16xi1>
    %23 = vector.broadcast %cst_8 : f32 to vector<40x16xf32>
    %24 = arith.select %22, %23, %20 : vector<40x16xi1>, vector<40x16xf32>
    %cst_9 = arith.constant dense<0xFF800000> : vector<40xf32>
    %25 = vector.multi_reduction <maximumf>, %24, %cst_9 [1] : vector<40x16xf32> to vector<40xf32>
    %26 = vector.shape_cast %25 : vector<40xf32> to vector<40x1xf32>
    %27 = vector.broadcast %26 : vector<40x1xf32> to vector<40x16xf32>
    %28 = arith.subf %24, %27 : vector<40x16xf32>
    %29 = math.exp %28 : vector<40x16xf32>
    %cst_10 = arith.constant dense<0.000000e+00> : vector<40xf32>
    %30 = vector.multi_reduction <add>, %29, %cst_10 [1] : vector<40x16xf32> to vector<40xf32>
    %31 = vector.shape_cast %30 : vector<40xf32> to vector<40x1xf32>
    %c0_11 = arith.constant 0 : index
    %c9 = arith.constant 9 : index
    %32 = vector.load %arg0[%c0_11, %c9] : memref<40x13xf32, #tpu.memory_space<vmem>>, vector<40x1xf32>
    %33 = tpu.reciprocal %31 : vector<40x1xf32> -> vector<40x1xf32>
    %34 = arith.mulf %32, %33 : vector<40x1xf32>
    %35 = vector.broadcast %34 : vector<40x1xf32> to vector<40x16xf32>
    %36 = arith.mulf %35, %29 : vector<40x16xf32>
    %37 = arith.addf %8, %36 : vector<40x16xf32>
    %c0_12 = arith.constant 0 : index
    %c1_13 = arith.constant 1 : index
    %38 = vector.load %arg0[%c0_12, %c1_13] : memref<40x13xf32, #tpu.memory_space<vmem>>, vector<40x1xf32>
    %39 = vector.broadcast %38 : vector<40x1xf32> to vector<40x16xf32>
    %40 = vector.broadcast %1 : vector<1x16xf32> to vector<40x16xf32>
    %41 = arith.mulf %39, %40 : vector<40x16xf32>
    %c0_14 = arith.constant 0 : index
    %c4 = arith.constant 4 : index
    %42 = vector.load %arg0[%c0_14, %c4] : memref<40x13xf32, #tpu.memory_space<vmem>>, vector<40x1xf32>
    %43 = vector.broadcast %0 : vector<1x16xf32> to vector<40x16xf32>
    %44 = vector.broadcast %42 : vector<40x1xf32> to vector<40x16xf32>
    %45 = arith.mulf %43, %44 : vector<40x16xf32>
    %46 = arith.subf %41, %45 : vector<40x16xf32>
    %c0_15 = arith.constant 0 : index
    %c7 = arith.constant 7 : index
    %47 = vector.load %arg0[%c0_15, %c7] : memref<40x13xf32, #tpu.memory_space<vmem>>, vector<40x1xf32>
    %48 = vector.broadcast %47 : vector<40x1xf32> to vector<40x16xf32>
    %49 = arith.addf %46, %48 : vector<40x16xf32>
    %cst_16 = arith.constant -6.77258873 : f32
    %50 = vector.shape_cast %4 : vector<1x16xi1> to vector<1x16xi1>
    %51 = vector.broadcast %50 : vector<1x16xi1> to vector<40x16xi1>
    %52 = vector.broadcast %cst_16 : f32 to vector<40x16xf32>
    %53 = arith.select %51, %52, %49 : vector<40x16xi1>, vector<40x16xf32>
    %cst_17 = arith.constant dense<0xFF800000> : vector<40xf32>
    %54 = vector.multi_reduction <maximumf>, %53, %cst_17 [1] : vector<40x16xf32> to vector<40xf32>
    %55 = vector.shape_cast %54 : vector<40xf32> to vector<40x1xf32>
    %56 = vector.broadcast %55 : vector<40x1xf32> to vector<40x16xf32>
    %57 = arith.subf %53, %56 : vector<40x16xf32>
    %58 = math.exp %57 : vector<40x16xf32>
    %cst_18 = arith.constant dense<0.000000e+00> : vector<40xf32>
    %59 = vector.multi_reduction <add>, %58, %cst_18 [1] : vector<40x16xf32> to vector<40xf32>
    %60 = vector.shape_cast %59 : vector<40xf32> to vector<40x1xf32>
    %c0_19 = arith.constant 0 : index
    %c10 = arith.constant 10 : index
    %61 = vector.load %arg0[%c0_19, %c10] : memref<40x13xf32, #tpu.memory_space<vmem>>, vector<40x1xf32>
    %62 = tpu.reciprocal %60 : vector<40x1xf32> -> vector<40x1xf32>
    %63 = arith.mulf %61, %62 : vector<40x1xf32>
    %64 = vector.broadcast %63 : vector<40x1xf32> to vector<40x16xf32>
    %65 = arith.mulf %64, %58 : vector<40x16xf32>
    %66 = arith.addf %37, %65 : vector<40x16xf32>
    %c0_20 = arith.constant 0 : index
    %c2_21 = arith.constant 2 : index
    %67 = vector.load %arg0[%c0_20, %c2_21] : memref<40x13xf32, #tpu.memory_space<vmem>>, vector<40x1xf32>
    %68 = vector.broadcast %67 : vector<40x1xf32> to vector<40x16xf32>
    %69 = vector.broadcast %1 : vector<1x16xf32> to vector<40x16xf32>
    %70 = arith.mulf %68, %69 : vector<40x16xf32>
    %c0_22 = arith.constant 0 : index
    %c5 = arith.constant 5 : index
    %71 = vector.load %arg0[%c0_22, %c5] : memref<40x13xf32, #tpu.memory_space<vmem>>, vector<40x1xf32>
    %72 = vector.broadcast %0 : vector<1x16xf32> to vector<40x16xf32>
    %73 = vector.broadcast %71 : vector<40x1xf32> to vector<40x16xf32>
    %74 = arith.mulf %72, %73 : vector<40x16xf32>
    %75 = arith.subf %70, %74 : vector<40x16xf32>
    %c0_23 = arith.constant 0 : index
    %c8 = arith.constant 8 : index
    %76 = vector.load %arg0[%c0_23, %c8] : memref<40x13xf32, #tpu.memory_space<vmem>>, vector<40x1xf32>
    %77 = vector.broadcast %76 : vector<40x1xf32> to vector<40x16xf32>
    %78 = arith.addf %75, %77 : vector<40x16xf32>
    %cst_24 = arith.constant -6.77258873 : f32
    %79 = vector.shape_cast %4 : vector<1x16xi1> to vector<1x16xi1>
    %80 = vector.broadcast %79 : vector<1x16xi1> to vector<40x16xi1>
    %81 = vector.broadcast %cst_24 : f32 to vector<40x16xf32>
    %82 = arith.select %80, %81, %78 : vector<40x16xi1>, vector<40x16xf32>
    %cst_25 = arith.constant dense<0xFF800000> : vector<40xf32>
    %83 = vector.multi_reduction <maximumf>, %82, %cst_25 [1] : vector<40x16xf32> to vector<40xf32>
    %84 = vector.shape_cast %83 : vector<40xf32> to vector<40x1xf32>
    %85 = vector.broadcast %84 : vector<40x1xf32> to vector<40x16xf32>
    %86 = arith.subf %82, %85 : vector<40x16xf32>
    %87 = math.exp %86 : vector<40x16xf32>
    %cst_26 = arith.constant dense<0.000000e+00> : vector<40xf32>
    %88 = vector.multi_reduction <add>, %87, %cst_26 [1] : vector<40x16xf32> to vector<40xf32>
    %89 = vector.shape_cast %88 : vector<40xf32> to vector<40x1xf32>
    %c0_27 = arith.constant 0 : index
    %c11 = arith.constant 11 : index
    %90 = vector.load %arg0[%c0_27, %c11] : memref<40x13xf32, #tpu.memory_space<vmem>>, vector<40x1xf32>
    %91 = tpu.reciprocal %89 : vector<40x1xf32> -> vector<40x1xf32>
    %92 = arith.mulf %90, %91 : vector<40x1xf32>
    %93 = vector.broadcast %92 : vector<40x1xf32> to vector<40x16xf32>
    %94 = arith.mulf %93, %87 : vector<40x16xf32>
    %95 = arith.addf %66, %94 : vector<40x16xf32>
    %96 = math.log %95 : vector<40x16xf32>
    %97 = tpu.iota {dimensions = array<i32: 0>} : vector<40x16xi32>
    %c1_i32 = arith.constant 1 : i32
    %98 = vector.broadcast %c1_i32 : i32 to vector<40x16xi32>
    %99 = arith.andi %97, %98 : vector<40x16xi32>
    %c0_i32 = arith.constant 0 : i32
    %100 = vector.broadcast %c0_i32 : i32 to vector<40x16xi32>
    %101 = arith.cmpi eq, %99, %100 : vector<40x16xi32>
    %cst_28 = arith.constant -2.77258873 : f32
    %102 = vector.broadcast %cst_28 : f32 to vector<40x16xf32>
    %103 = arith.select %101, %102, %96 : vector<40x16xi1>, vector<40x16xf32>
    %c0_29 = arith.constant 0 : index
    %c0_30 = arith.constant 0 : index
    %104 = vector.load %arg2[%c0_29, %c0_30] : memref<40x16xf32, #tpu.memory_space<vmem>>, vector<40x16xf32>
    tpu.vector_store %arg2[%c0_29, %c0_30], %103 {strides = array<i32>} : memref<40x16xf32, #tpu.memory_space<vmem>>, vector<40x16xf32>,
    return
  }
}

</mosaic_0001>

<bundles_post_ra>
// kernel: gamma_duration_forward.1
= control target key start
LH: loop header
LB: loop body
LE: loop exit
PB: predicated region body
PF: predicated region fallthrough
CT: control target
= control target key end

     0   :  { %v783_v2 = vmov 12   ;;  %s1173_s0 = inlined_call_operand.vmem [shape: f32[40,13], index: 0, kind: input, shape index: {}]   ;;  %s1174_s1 = inlined_call_operand.vmem [shape: f32[3,16], index: 1, kind: input, shape index: {}]   ;;  %s1175_s2 = inlined_call_operand.hbm [shape: f32[40,16], index: 2, kind: output, shape index: {}]  }
   0x1   :  { %v817_v0 = vld [vmem:[%s1173_s0 + $0x10] sm:$0xff]  ;;  %v822_v1 = vld [vmem:[%s1173_s0] sm:$0xff]  ;;  %666 = vset.pattern.permute.xlu1 %v783_v2  ;;  %665 = vset.pattern.permute.xlu0 %v783_v2  ;;  %v829_v3 = vld [vmem:[%s1173_s0 + $0x18] sm:$0xff] }
   0x2   :  { %33 = vperm.xlu1 %666, %v817_v0   ;;  %23 = vperm.xlu0 %665, %v822_v1   ;;  %v834_v4 = vld [vmem:[%s1173_s0 + $0x8] sm:$0xff] }
   0x3   :  { %7 = vsyncpa [#allocation3], 0  ;;  %v841_v5 = vld [vmem:[%s1173_s0 + $0x20] sm:$0xff]  ;;  %v784_v6 = vmov 0   ;;  %v785_v7 = vmov 3   ;;  %v786_v8 = vmov 6   ;;  %v84_v23 = vlaneseq }
   0x4   :  { %v787_v9 = vmov 1   ;;  %v788_v10 = vmov 4   ;;  %v789_v11 = vmov 2   ;;  %v790_v12 = vmov 5   ;;  %v12_v30 = vld [vmem:[%s1174_s1] sm:$0x1] }
   0x5   :  { %v791_v13 = vmov 7   ;;  %v792_v14 = vmov 8   ;;  %v901_v26 = vshrl.u32 %v84_v23, 7  ;;  %vm15_vm0 = vcmp.le.f32.partialorder %v12_v30, 3.0  ;;  %v912_v34 = vld [vmem:[%s1174_s1 + $0x1] ss:$0 sm:$0xff] }
   0x6   :  { %38 = vperm.xlu1 %666, %v829_v3   ;;  %28 = vperm.xlu0 %665, %v834_v4   ;;  %v143_v37 = vsel %vm15_vm0, 1, %v784_v6  ;;  %vm154_vm2 = vcmask 130048  }
   0x7   :  { %v86_v27 = vsub.s32 0, %v901_v26 }
   0x9   :  { %v907_v31 = vrot.slane %v12_v30, %v86_v27  ;;  %v919_v43 = vrot.slane %v143_v37, %v86_v27 }
   0xa   :  { %667 = vset.pattern.permute.xlu1 %v784_v6  ;;  %43 = vperm.xlu0 %665, %v841_v5  }
   0xb   :  { %56 = vperm.xlu1 %667, %v822_v1   ;;  %vm148_vm1 = vcmp.eq.s32.totalorder %v919_v43, 1 }
   0xe   :  { %668 = vset.pattern.permute.xlu0 %v784_v6 }
   0xf   :  { %64 = vperm.xlu1 %667, %v817_v0   ;;  %60 = vperm.xlu0 %668, %v834_v4  }
  0x13   :  { %68 = vperm.xlu1 %667, %v829_v3   ;;  %72 = vperm.xlu0 %668, %v841_v5  }
  0x17   :  { %669 = vset.pattern.permute.xlu1 %v785_v7  ;;  %670 = vset.pattern.permute.xlu0 %v785_v7 }
  0x18   :  { %89 = vperm.xlu1 %669, %v822_v1   ;;  %93 = vperm.xlu0 %670, %v834_v4  }
  0x1c   :  { %97 = vperm.xlu1 %669, %v817_v0   ;;  %105 = vperm.xlu0 %670, %v841_v5  }
  0x20   :  { %101 = vperm.xlu1 %669, %v829_v3   ;;  %672 = vset.pattern.permute.xlu0 %v786_v8 }
  0x21   :  { %123 = vperm.xlu0 %672, %v834_v4  }
  0x24   :  { %671 = vset.pattern.permute.xlu1 %v786_v8 }
  0x25   :  { %119 = vperm.xlu1 %671, %v822_v1   ;;  %135 = vperm.xlu0 %672, %v841_v5  }
  0x29   :  { %127 = vperm.xlu1 %671, %v817_v0   ;;  %673 = vset.pattern.permute.xlu0 %v787_v9 }
  0x2a   :  { %246 = vperm.xlu0 %673, %v822_v1  }
  0x2d   :  { %131 = vperm.xlu1 %671, %v829_v3  }
  0x2e   :  { %250 = vperm.xlu0 %673, %v834_v4  }
  0x31   :  { %675 = vset.pattern.permute.xlu1 %v788_v10 }
  0x32   :  { %279 = vperm.xlu1 %675, %v817_v0   ;;  %254 = vperm.xlu0 %673, %v817_v0  }
  0x36   :  { %677 = vset.pattern.permute.xlu1 %v789_v11  ;;  %258 = vperm.xlu0 %673, %v829_v3  }
  0x37   :  { %425 = vperm.xlu1 %677, %v834_v4  }
  0x3a   :  { %262 = vperm.xlu0 %673, %v841_v5  }
  0x3b   :  { %433 = vperm.xlu1 %677, %v829_v3  }
  0x3e   :  { %674 = vset.pattern.permute.xlu0 %v788_v10 }
  0x3f   :  { %678 = vset.pattern.permute.xlu1 %v790_v12  ;;  %271 = vperm.xlu0 %674, %v822_v1  }
  0x40   :  { %446 = vperm.xlu1 %678, %v822_v1  }
  0x43   :  { %275 = vperm.xlu0 %674, %v834_v4  }
  0x44   :  { %454 = vperm.xlu1 %678, %v817_v0  }
  0x47   :  { %283 = vperm.xlu0 %674, %v829_v3  }
  0x48   :  { %458 = vperm.xlu1 %678, %v829_v3  }
  0x4b   :  { %287 = vperm.xlu0 %674, %v841_v5  }
  0x4c   :  { %680 = vset.pattern.permute.xlu1 %v791_v13 }
  0x4d   :  { %301 = vperm.xlu1 %680, %v822_v1  }
  0x4f   :  { %676 = vset.pattern.permute.xlu0 %v789_v11 }
  0x50   :  { %421 = vperm.xlu0 %676, %v822_v1  }
  0x51   :  { %309 = vperm.xlu1 %680, %v817_v0  }
  0x54   :  { %429 = vperm.xlu0 %676, %v817_v0  }
  0x55   :  { %313 = vperm.xlu1 %680, %v829_v3  }
  0x58   :  { %437 = vperm.xlu0 %676, %v841_v5  }
  0x59   :  { %682 = vset.pattern.permute.xlu1 %v792_v14 }
  0x5a   :  { %476 = vperm.xlu1 %682, %v822_v1  }
  0x5c   :  { %679 = vset.pattern.permute.xlu0 %v790_v12 }
  0x5d   :  { %450 = vperm.xlu0 %679, %v834_v4  }
  0x5e   :  { %484 = vperm.xlu1 %682, %v817_v0  }
  0x61   :  { %462 = vperm.xlu0 %679, %v841_v5  }
  0x62   :  { %488 = vperm.xlu1 %682, %v829_v3  }
  0x65   :  { %681 = vset.pattern.permute.xlu0 %v791_v13 }
  0x66   :  { %305 = vperm.xlu0 %681, %v834_v4  }
  0x6a   :  { %317 = vperm.xlu0 %681, %v841_v5  }
  0x6e   :  { %683 = vset.pattern.permute.xlu0 %v792_v14 }
  0x6f   :  { %480 = vperm.xlu0 %683, %v834_v4  }
  0x73   :  { %492 = vperm.xlu0 %683, %v841_v5  }
  0x81   :  { %v891_v15 = vpop.permute.xlu0 %23  ;;  %v893_v16 = vpop.permute.xlu1 %33 }
  0x85   :  { %v895_v17 = vpop.permute.xlu0 %28  ;;  %v897_v18 = vpop.permute.xlu1 %38 }
  0x89   :  { %v899_v19 = vpop.permute.xlu0 %43 }
  0x8a   :  { %v57_v20 = vpop.permute.xlu1 %56 }
  0x8b   :  { %v79_v35 = vmul.f32 %v912_v34, %v57_v20 }
  0x8e   :  { %v61_v21 = vpop.permute.xlu0 %60  ;;  %v65_v22 = vpop.permute.xlu1 %64 }
  0x8f   :  { %v80_v41 = vmul.f32 %v912_v34, %v61_v21  ;;  %v81_v44 = vmul.f32 %v912_v34, %v65_v22 }
  0x92   :  { %v73_v24 = vpop.permute.xlu0 %72  ;;  %v69_v25 = vpop.permute.xlu1 %68 }
  0x93   :  { %v83_v50 = vmul.f32 %v912_v34, %v73_v24  ;;  %v82_v53 = vmul.f32 %v912_v34, %v69_v25 }
  0x97   :  { %v90_v28 = vpop.permute.xlu1 %89  ;;  %v94_v29 = vpop.permute.xlu0 %93 }
  0x98   :  { %v108_v36 = vmul.f32 %v90_v28, %v907_v31  ;;  %v109_v38 = vmul.f32 %v94_v29, %v907_v31 }
  0x9a   :  { %v113_v42 = vsub.f32 %v79_v35, %v108_v36  ;;  %v114_v47 = vsub.f32 %v80_v41, %v109_v38 }
  0x9b   :  { %v98_v32 = vpop.permute.xlu1 %97  ;;  %v106_v33 = vpop.permute.xlu0 %105 }
  0x9c   :  { %v110_v45 = vmul.f32 %v98_v32, %v907_v31  ;;  %v112_v46 = vmul.f32 %v106_v33, %v907_v31 }
  0x9e   :  { %v117_v55 = vsub.f32 %v83_v50, %v112_v46  ;;  %v115_v56 = vsub.f32 %v81_v44, %v110_v45 }
  0x9f   :  { %v102_v39 = vpop.permute.xlu1 %101 }
  0xa0   :  { %v124_v40 = vpop.permute.xlu0 %123  ;;  %v111_v54 = vmul.f32 %v102_v39, %v907_v31 }
  0xa1   :  { %v139_v51 = vadd.f32 %v124_v40, %v114_v47 }
  0xa2   :  { %v116_v2 = vsub.f32 %v82_v53, %v111_v54 }
  0xa3   :  { %v936_v63 = vsel %vm148_vm1, -6.7725887, %v139_v51 }
  0xa4   :  { %v120_v48 = vpop.permute.xlu1 %119  ;;  %v136_v49 = vpop.permute.xlu0 %135  ;;  %v158_v9 = vsel %vm154_vm2, %v936_v63, -inf }
  0xa5   :  { %v138_v52 = vadd.f32 %v120_v48, %v113_v42  ;;  %v142_v60 = vadd.f32 %v136_v49, %v117_v55 }
  0xa7   :  { %v930_v57 = vsel %vm148_vm1, -6.7725887, %v138_v52  ;;  %v948_v12 = vsel %vm148_vm1, -6.7725887, %v142_v60 }
  0xa8   :  { %v128_v58 = vpop.permute.xlu1 %127  ;;  %v155_v59 = vsel %vm154_vm2, %v930_v57, -inf  ;;  %v167_v20 = vsel %vm154_vm2, %v948_v12, -inf }
  0xa9   :  { %v140_v61 = vadd.f32 %v128_v58, %v115_v56  ;;  %v247_v62 = vpop.permute.xlu0 %246  ;;  %156 = vmax.xlane.f32.xlu1 %v155_v59 }
  0xaa   :  { %v265_v37 = vmul.f32 %v912_v34, %v247_v62 }
  0xab   :  { %v940_v6 = vsel %vm148_vm1, -6.7725887, %v140_v61 }
  0xac   :  { %v132_v7 = vpop.permute.xlu1 %131  ;;  %v161_v8 = vsel %vm154_vm2, %v940_v6, -inf }
  0xad   :  { %v141_v10 = vadd.f32 %v132_v7, %v116_v2  ;;  %v251_v11 = vpop.permute.xlu0 %250  ;;  %162 = vmax.xlane.f32.xlu0 %v161_v8  ;;  %159 = vmax.xlane.f32.xlu1 %v158_v9 }
  0xae   :  { %v266_v62 = vmul.f32 %v912_v34, %v251_v11 }
  0xaf   :  { %v952_v13 = vsel %vm148_vm1, -6.7725887, %v141_v10 }
  0xb0   :  { %v164_v14 = vsel %vm154_vm2, %v952_v13, -inf }
  0xb1   :  { %v255_v21 = vpop.permute.xlu0 %254  ;;  %165 = vmax.xlane.f32.xlu0 %v164_v14  ;;  %168 = vmax.xlane.f32.xlu1 %v167_v20  ;;  %v280_v22 = vpop.permute.xlu1 %279 }
  0xb2   :  { %v292_v39 = vmul.f32 %v280_v22, %v907_v31  ;;  %v267_v40 = vmul.f32 %v912_v34, %v255_v21 }
  0xb4   :  { %v297_v46 = vsub.f32 %v267_v40, %v292_v39 }
  0xb5   :  { %v259_v23 = vpop.permute.xlu0 %258 }
  0xb6   :  { %v426_v24 = vpop.permute.xlu1 %425  ;;  %v268_v2 = vmul.f32 %v912_v34, %v259_v23 }
  0xb9   :  { %v263_v25 = vpop.permute.xlu0 %262 }
  0xba   :  { %v434_v27 = vpop.permute.xlu1 %433  ;;  %v269_v21 = vmul.f32 %v912_v34, %v263_v25 }
  0xbe   :  { %v272_v28 = vpop.permute.xlu0 %271 }
  0xbf   :  { %v447_v29 = vpop.permute.xlu1 %446  ;;  %v290_v35 = vmul.f32 %v272_v28, %v907_v31 }
  0xc0   :  { %v465_v7 = vmul.f32 %v447_v29, %v907_v31 }
  0xc1   :  { %v295_v41 = vsub.f32 %v265_v37, %v290_v35 }
  0xc2   :  { %v276_v30 = vpop.permute.xlu0 %275 }
  0xc3   :  { %v455_v32 = vpop.permute.xlu1 %454  ;;  %v291_v58 = vmul.f32 %v276_v30, %v907_v31 }
  0xc4   :  { %v467_v11 = vmul.f32 %v455_v32, %v907_v31 }
  0xc5   :  { %v296_v14 = vsub.f32 %v266_v62, %v291_v58 }
  0xc6   :  { %v284_v33 = vpop.permute.xlu0 %283 }
  0xc7   :  { %v459_v36 = vpop.permute.xlu1 %458  ;;  %v293_v59 = vmul.f32 %v284_v33, %v907_v31  ;;  %v443_v33 = vmul.f32 %v912_v34, %v434_v27 }
  0xc8   :  { %v468_v23 = vmul.f32 %v459_v36, %v907_v31  ;;  %v441_v36 = vmul.f32 %v912_v34, %v426_v24 }
  0xc9   :  { %v298_v10 = vsub.f32 %v268_v2, %v293_v59 }
  0xca   :  { %v288_v38 = vpop.permute.xlu0 %287 }
  0xcb   :  { %v294_v8 = vmul.f32 %v288_v38, %v907_v31 }
  0xcc   :  { %v302_v42 = vpop.permute.xlu1 %301 }
  0xcd   :  { %v320_v44 = vadd.f32 %v302_v42, %v295_v41  ;;  %v299_v37 = vsub.f32 %v269_v21, %v294_v8 }
  0xcf   :  { %v422_v45 = vpop.permute.xlu0 %421  ;;  %v964_v47 = vsel %vm148_vm1, -6.7725887, %v320_v44 }
  0xd0   :  { %v310_v48 = vpop.permute.xlu1 %309  ;;  %v330_v49 = vsel %vm154_vm2, %v964_v47, -inf  ;;  %v440_v9 = vmul.f32 %v912_v34, %v422_v45  ;;  %v473_v45 = vsub.f32 %v443_v33, %v468_v23 }
  0xd1   :  { %v322_v50 = vadd.f32 %v310_v48, %v297_v46  ;;  %331 = vmax.xlane.f32.xlu0 %v330_v49 }
  0xd2   :  { %v470_v35 = vsub.f32 %v440_v9, %v465_v7 }
  0xd3   :  { %v430_v51 = vpop.permute.xlu0 %429  ;;  %v970_v52 = vsel %vm148_vm1, -6.7725887, %v322_v50 }
  0xd4   :  { %v336_v53 = vsel %vm154_vm2, %v970_v52, -inf  ;;  %v314_v55 = vpop.permute.xlu1 %313  ;;  %v442_v29 = vmul.f32 %v912_v34, %v430_v51 }
  0xd5   :  { %337 = vmax.xlane.f32.xlu0 %v336_v53  ;;  %v323_v22 = vadd.f32 %v314_v55, %v298_v10 }
  0xd6   :  { %v472_v42 = vsub.f32 %v442_v29, %v467_v11 }
  0xd7   :  { %v438_v54 = vpop.permute.xlu0 %437  ;;  %v995_v32 = vsel %vm148_vm1, -6.7725887, %v323_v22 }
  0xd8   :  { %v339_v51 = vsel %vm154_vm2, %v995_v32, -inf }
  0xd9   :  { %v477_v60 = vpop.permute.xlu1 %476 }
  0xda   :  { %v495_v41 = vadd.f32 %v477_v60, %v470_v35 }
  0xdc   :  { %v451_v56 = vpop.permute.xlu0 %450  ;;  %v1009_v24 = vsel %vm148_vm1, -6.7725887, %v495_v41 }
  0xdd   :  { %v485_v28 = vpop.permute.xlu1 %484  ;;  %v466_v39 = vmul.f32 %v451_v56, %v907_v31  ;;  %v444_v56 = vmul.f32 %v912_v34, %v438_v54  ;;  %v505_v60 = vsel %vm154_vm2, %v1009_v24, -inf }
  0xde   :  { %v497_v53 = vadd.f32 %v485_v28, %v472_v42 }
  0xdf   :  { %v471_v49 = vsub.f32 %v441_v36, %v466_v39 }
  0xe0   :  { %v463_v61 = vpop.permute.xlu0 %462  ;;  %v1022_v7 = vsel %vm148_vm1, -6.7725887, %v497_v53 }
  0xe1   :  { %v489_v44 = vpop.permute.xlu1 %488  ;;  %v469_v48 = vmul.f32 %v463_v61, %v907_v31  ;;  %v511_v8 = vsel %vm154_vm2, %v1022_v7, -inf }
  0xe2   :  { %v498_v58 = vadd.f32 %v489_v44, %v473_v45 }
  0xe3   :  { %v474_v31 = vsub.f32 %v444_v56, %v469_v48 }
  0xe4   :  { %v1026_v54 = vsel %vm148_vm1, -6.7725887, %v498_v58 }
  0xe5   :  { %v306_v20 = vpop.permute.xlu0 %305  ;;  %v514_v9 = vsel %vm154_vm2, %v1026_v54, -inf }
  0xe6   :  { %v321_v30 = vadd.f32 %v306_v20, %v296_v14 }
  0xe8   :  { %v988_v38 = vsel %vm148_vm1, -6.7725887, %v321_v30 }
  0xe9   :  { %v318_v25 = vpop.permute.xlu0 %317  ;;  %v333_v40 = vsel %vm154_vm2, %v988_v38, -inf }
  0xea   :  { %v324_v27 = vadd.f32 %v318_v25, %v299_v37  ;;  %334 = vmax.xlane.f32.xlu1 %v333_v40 }
  0xec   :  { %v1000_v46 = vsel %vm148_vm1, -6.7725887, %v324_v27 }
  0xed   :  { %v342_v50 = vsel %vm154_vm2, %v1000_v46, -inf }
  0xee   :  { %v481_v55 = vpop.permute.xlu0 %480  ;;  %343 = vmax.xlane.f32.xlu0 %v342_v50  ;;  %340 = vmax.xlane.f32.xlu1 %v339_v51 }
  0xef   :  { %v496_v59 = vadd.f32 %v481_v55, %v471_v49  ;;  %v793_v49 = vmov 9  }
  0xf0   :  { %684 = vset.pattern.permute.xlu1 %v793_v49  ;;  %685 = vset.pattern.permute.xlu0 %v793_v49 }
  0xf1   :  { %v1016_v61 = vsel %vm148_vm1, -6.7725887, %v496_v59 }
  0xf2   :  { %v493_v62 = vpop.permute.xlu0 %492  ;;  %506 = vmax.xlane.f32.xlu1 %v505_v60  ;;  %v508_v2 = vsel %vm154_vm2, %v1016_v61, -inf }
  0xf3   :  { %v499_v34 = vadd.f32 %v493_v62, %v474_v31  ;;  %509 = vmax.xlane.f32.xlu0 %v508_v2 }
  0xf5   :  { %v1034_v10 = vsel %vm148_vm1, -6.7725887, %v499_v34 }
  0xf6   :  { %512 = vmax.xlane.f32.xlu1 %v511_v8  ;;  %v517_v14 = vsel %vm154_vm2, %v1034_v10, -inf }
  0xf7   :  { %515 = vmax.xlane.f32.xlu0 %v514_v9 }
  0xfa   :  { %518 = vmax.xlane.f32.xlu1 %v517_v14 }
 0x136   :  { %v157_v20 = vpop.xlane.xlu1 %156 }
 0x137   :  { %v170_v21 = vsub.f32 %v930_v57, %v157_v20 }
 0x139   :  { %v175_v22 = vmul.f32 1.442695, %v170_v21 }
 0x13a   :  { %v163_v28 = vpop.xlane.xlu0 %162  ;;  %v160_v30 = vpop.xlane.xlu1 %159 }
 0x13b   :  { %689 = vpow2.f32 %v175_v22  ;;  %v172_v33 = vsub.f32 %v940_v6, %v163_v28  ;;  %v171_v11 = vsub.f32 %v936_v63, %v160_v30 }
 0x13d   :  { %v179_v23 = vmul.f32 1.442695, %v172_v33  ;;  %v177_v43 = vmul.f32 1.442695, %v171_v11 }
 0x13e   :  { %v166_v29 = vpop.xlane.xlu0 %165  ;;  %v169_v35 = vpop.xlane.xlu1 %168 }
 0x13f   :  { %691 = vpow2.f32 %v179_v23  ;;  %v173_v37 = vsub.f32 %v952_v13, %v166_v29  ;;  %v174_v39 = vsub.f32 %v948_v12, %v169_v35 }
 0x140   :  { %693 = vpow2.f32 %v177_v43 }
 0x141   :  { %v181_v25 = vmul.f32 1.442695, %v173_v37  ;;  %v183_v57 = vmul.f32 1.442695, %v174_v39 }
 0x143   :  { %695 = vpow2.f32 %v181_v25 }
 0x144   :  { %697 = vpow2.f32 %v183_v57 }
 0x145   :  { %v1043_v40 = vpop.eup %689 }
 0x146   :  { %v185_v6 = vsel %vm154_vm2, %v1043_v40, 0.0 }
 0x147   :  { %186 = vadd.xlane.f32.xlu0 %v185_v6 }
 0x149   :  { %v1047_v63 = vpop.eup %691 }
 0x14a   :  { %v1049_v41 = vpop.eup %693  ;;  %v191_v13 = vsel %vm154_vm2, %v1047_v63, 0.0 }
 0x14b   :  { %192 = vadd.xlane.f32.xlu0 %v191_v13  ;;  %v188_v12 = vsel %vm154_vm2, %v1049_v41, 0.0 }
 0x14c   :  { %189 = vadd.xlane.f32.xlu1 %v188_v12 }
 0x14d   :  { %v1055_v27 = vpop.eup %695 }
 0x14e   :  { %v1057_v36 = vpop.eup %697  ;;  %v194_v42 = vsel %vm154_vm2, %v1055_v27, 0.0 }
 0x14f   :  { %v197_v44 = vsel %vm154_vm2, %v1057_v36, 0.0 }
 0x150   :  { %195 = vadd.xlane.f32.xlu1 %v194_v42  ;;  %198 = vadd.xlane.f32.xlu0 %v197_v44 }
 0x15e   :  { %v332_v45 = vpop.xlane.xlu0 %331 }
 0x15f   :  { %v345_v48 = vsub.f32 %v964_v47, %v332_v45 }
 0x161   :  { %v350_v50 = vmul.f32 1.442695, %v345_v48 }
 0x162   :  { %v338_v51 = vpop.xlane.xlu0 %337 }
 0x163   :  { %699 = vpow2.f32 %v350_v50  ;;  %v347_v53 = vsub.f32 %v970_v52, %v338_v51 }
 0x165   :  { %v354_v55 = vmul.f32 1.442695, %v347_v53 }
 0x167   :  { %701 = vpow2.f32 %v354_v55 }
 0x16d   :  { %v1065_v56 = vpop.eup %699 }
 0x16e   :  { %v360_v58 = vsel %vm154_vm2, %v1065_v56, 0.0 }
 0x16f   :  { %361 = vadd.xlane.f32.xlu1 %v360_v58 }
 0x171   :  { %v1069_v59 = vpop.eup %701 }
 0x172   :  { %v366_v47 = vsel %vm154_vm2, %v1069_v59, 0.0 }
 0x173   :  { %367 = vadd.xlane.f32.xlu1 %v366_v47 }
 0x177   :  { %v335_v31 = vpop.xlane.xlu1 %334 }
 0x178   :  { %v346_v60 = vsub.f32 %v988_v38, %v335_v31 }
 0x17a   :  { %v352_v62 = vmul.f32 1.442695, %v346_v60 }
 0x17b   :  { %v344_v2 = vpop.xlane.xlu0 %343  ;;  %v341_v52 = vpop.xlane.xlu1 %340 }
 0x17c   :  { %703 = vpow2.f32 %v352_v62  ;;  %v349_v34 = vsub.f32 %v1000_v46, %v344_v2  ;;  %v348_v8 = vsub.f32 %v995_v32, %v341_v52 }
 0x17e   :  { %v358_v9 = vmul.f32 1.442695, %v349_v34  ;;  %v356_v14 = vmul.f32 1.442695, %v348_v8 }
 0x17f   :  { %v507_v20 = vpop.xlane.xlu1 %506 }
 0x180   :  { %705 = vpow2.f32 %v358_v9  ;;  %v520_v21 = vsub.f32 %v1009_v24, %v507_v20  ;;  %v510_v22 = vpop.xlane.xlu0 %509 }
 0x181   :  { %707 = vpow2.f32 %v356_v14  ;;  %v521_v28 = vsub.f32 %v1016_v61, %v510_v22  ;;  %v794_v14 = vmov 11  }
 0x182   :  { %v525_v30 = vmul.f32 1.442695, %v520_v21  ;;  %v795_v21 = vmov 10  }
 0x183   :  { %v527_v38 = vmul.f32 1.442695, %v521_v28  ;;  %v513_v33 = vpop.xlane.xlu1 %512 }
 0x184   :  { %709 = vpow2.f32 %v525_v30  ;;  %v522_v11 = vsub.f32 %v1022_v7, %v513_v33  ;;  %v516_v23 = vpop.xlane.xlu0 %515 }
 0x185   :  { %711 = vpow2.f32 %v527_v38  ;;  %v523_v32 = vsub.f32 %v1026_v54, %v516_v23 }
 0x186   :  { %v1080_v46 = vpop.eup %703  ;;  %v529_v43 = vmul.f32 1.442695, %v522_v11 }
 0x187   :  { %v531_v29 = vmul.f32 1.442695, %v523_v32  ;;  %v519_v35 = vpop.xlane.xlu1 %518  ;;  %v363_v24 = vsel %vm154_vm2, %v1080_v46, 0.0 }
 0x188   :  { %713 = vpow2.f32 %v529_v43  ;;  %v524_v61 = vsub.f32 %v1034_v10, %v519_v35  ;;  %364 = vadd.xlane.f32.xlu0 %v363_v24 }
 0x189   :  { %715 = vpow2.f32 %v531_v29 }
 0x18a   :  { %v1085_v37 = vpop.eup %705  ;;  %v533_v7 = vmul.f32 1.442695, %v524_v61 }
 0x18b   :  { %v1087_v39 = vpop.eup %707  ;;  %v372_v54 = vsel %vm154_vm2, %v1085_v37, 0.0 }
 0x18c   :  { %717 = vpow2.f32 %v533_v7  ;;  %373 = vadd.xlane.f32.xlu1 %v372_v54  ;;  %v369_v25 = vsel %vm154_vm2, %v1087_v39, 0.0 }
 0x18d   :  { %370 = vadd.xlane.f32.xlu0 %v369_v25 }
 0x18e   :  { %v1093_v57 = vpop.eup %709 }
 0x18f   :  { %v1095_v6 = vpop.eup %711  ;;  %v535_v10 = vsel %vm154_vm2, %v1093_v57, 0.0 }
 0x190   :  { %v538_v13 = vsel %vm154_vm2, %v1095_v6, 0.0 }
 0x191   :  { %536 = vadd.xlane.f32.xlu0 %v535_v10  ;;  %539 = vadd.xlane.f32.xlu1 %v538_v13 }
 0x192   :  { %v1101_v12 = vpop.eup %713 }
 0x193   :  { %v1103_v42 = vpop.eup %715  ;;  %v541_v44 = vsel %vm154_vm2, %v1101_v12, 0.0 }
 0x194   :  { %v544_v45 = vsel %vm154_vm2, %v1103_v42, 0.0 }
 0x195   :  { %542 = vadd.xlane.f32.xlu0 %v541_v44  ;;  %545 = vadd.xlane.f32.xlu1 %v544_v45 }
 0x196   :  { %v1109_v48 = vpop.eup %717 }
 0x197   :  { %v547_v49 = vsel %vm154_vm2, %v1109_v48, 0.0 }
 0x199   :  { %548 = vadd.xlane.f32.xlu0 %v547_v49 }
 0x1d4   :  { %v187_v50 = vpop.xlane.xlu0 %186 }
 0x1d5   :  { %719 = vrcp.f32 %v187_v50 }
 0x1d8   :  { %v193_v51 = vpop.xlane.xlu0 %192 }
 0x1d9   :  { %721 = vrcp.f32 %v193_v51  ;;  %v190_v53 = vpop.xlane.xlu1 %189 }
 0x1da   :  { %723 = vrcp.f32 %v190_v53 }
 0x1dd   :  { %v196_v55 = vpop.xlane.xlu1 %195  ;;  %v199_v58 = vpop.xlane.xlu0 %198 }
 0x1de   :  { %725 = vrcp.f32 %v196_v55 }
 0x1df   :  { %v720_v47 = vpop.eup %719  ;;  %727 = vrcp.f32 %v199_v58 }
 0x1e0   :  { %v205_v31 = vmul.f32 %v720_v47, %v822_v1 }
 0x1e2   :  { %212 = vperm.xlu1 %684, %v205_v31  }
 0x1e3   :  { %v722_v60 = vpop.eup %721 }
 0x1e4   :  { %v724_v62 = vpop.eup %723  ;;  %v207_v2 = vmul.f32 %v722_v60, %v817_v0 }
 0x1e5   :  { %v206_v52 = vmul.f32 %v724_v62, %v834_v4 }
 0x1e6   :  { %222 = vperm.xlu1 %684, %v207_v2  }
 0x1e7   :  { %217 = vperm.xlu0 %685, %v206_v52  }
 0x1e8   :  { %v726_v34 = vpop.eup %725 }
 0x1e9   :  { %v208_v8 = vmul.f32 %v726_v34, %v829_v3  ;;  %v728_v9 = vpop.eup %727 }
 0x1ea   :  { %v209_v20 = vmul.f32 %v728_v9, %v841_v5 }
 0x1eb   :  { %687 = vset.pattern.permute.xlu0 %v794_v14  ;;  %227 = vperm.xlu1 %684, %v208_v8  }
 0x1ef   :  { %232 = vperm.xlu1 %684, %v209_v20  }
 0x1f3   :  { %686 = vset.pattern.permute.xlu1 %v795_v21 }
 0x1fc   :  { %v362_v22 = vpop.xlane.xlu1 %361 }
 0x1fd   :  { %729 = vrcp.f32 %v362_v22 }
 0x200   :  { %v368_v38 = vpop.xlane.xlu1 %367 }
 0x207   :  { %v730_v28 = vpop.eup %729 }
 0x208   :  { %v380_v30 = vmul.f32 %v730_v28, %v822_v1 }
 0x20a   :  { %387 = vperm.xlu1 %686, %v380_v30  }
 0x215   :  { %v365_v33 = vpop.xlane.xlu0 %364 }
 0x216   :  { %731 = vrcp.f32 %v365_v33 }
 0x217   :  { %733 = vrcp.f32 %v368_v38 }
 0x219   :  { %v374_v11 = vpop.xlane.xlu1 %373 }
 0x21a   :  { %v371_v23 = vpop.xlane.xlu0 %370 }
 0x21b   :  { %735 = vrcp.f32 %v371_v23 }
 0x21e   :  { %v537_v32 = vpop.xlane.xlu0 %536  ;;  %v540_v43 = vpop.xlane.xlu1 %539 }
 0x21f   :  { %737 = vrcp.f32 %v537_v32 }
 0x220   :  { %v732_v29 = vpop.eup %731  ;;  %739 = vrcp.f32 %v374_v11 }
 0x221   :  { %v381_v35 = vmul.f32 %v732_v29, %v834_v4  ;;  %v734_v24 = vpop.eup %733 }
 0x222   :  { %v546_v61 = vpop.xlane.xlu1 %545  ;;  %v543_v7 = vpop.xlane.xlu0 %542  ;;  %v382_v54 = vmul.f32 %v734_v24, %v817_v0 }
 0x223   :  { %392 = vperm.xlu1 %686, %v381_v35   ;;  %741 = vrcp.f32 %v546_v61 }
 0x224   :  { %743 = vrcp.f32 %v540_v43 }
 0x225   :  { %v736_v25 = vpop.eup %735  ;;  %745 = vrcp.f32 %v543_v7 }
 0x226   :  { %v383_v13 = vmul.f32 %v736_v25, %v829_v3  ;;  %v549_v45 = vpop.xlane.xlu0 %548 }
 0x227   :  { %397 = vperm.xlu1 %686, %v382_v54   ;;  %747 = vrcp.f32 %v549_v45 }
 0x229   :  { %v738_v10 = vpop.eup %737 }
 0x22a   :  { %v740_v44 = vpop.eup %739  ;;  %v555_v49 = vmul.f32 %v738_v10, %v822_v1  ;;  %v611_v10 = vand.u32 1, %v901_v26 }
 0x22b   :  { %402 = vperm.xlu1 %686, %v383_v13   ;;  %v384_v50 = vmul.f32 %v740_v44, %v841_v5 }
 0x22c   :  { %562 = vperm.xlu0 %687, %v555_v49   ;;  %vm616_vm3 = vcmp.eq.s32.totalorder %v611_v10, 0 }
 0x22d   :  { %v742_v51 = vpop.eup %741 }
 0x22e   :  { %v744_v53 = vpop.eup %743  ;;  %v558_v55 = vmul.f32 %v742_v51, %v829_v3  ;;  %v647_v3 = vld [vmem:[%s1174_s1 + $0x2] ss:$0 sm:$0xff]  ;;  %s796_s1 = smov [#allocation2]  }
 0x22f   :  { %407 = vperm.xlu1 %686, %v384_v50   ;;  %v556_v58 = vmul.f32 %v744_v53, %v834_v4  ;;  %v746_v47 = vpop.eup %745  ;;  %v53_v11 = vmul.f32 %v647_v3, %v897_v18  ;;  %v607_v50 = vadd.s32 8, %v901_v26  ;;  %s636_s24 = sshll.u32 %s796_s1, 4  ;;  %s637_s24 = int_to_ptr.vmem [resolvable:$true] %s636_s24 }
 0x230   :  { %577 = vperm.xlu0 %687, %v558_v55   ;;  %v557_v31 = vmul.f32 %v746_v47, %v817_v0  ;;  %v50_v0 = vmul.f32 %v647_v3, %v891_v15  ;;  %v51_v15 = vmul.f32 %v647_v3, %v895_v17  ;;  %s759_s25 = scalar_lea.vmem %s637_s24, 640  ;;  %p764_p1 = scmp.lt.s32.totalorder %s637_s24, %s637_s24 }
 0x231   :  { %v748_v60 = vpop.eup %747  ;;  %p760_p0 = scmp.ne.s32.totalorder %s637_s24, %s759_s25  ;;  %p765_p2 = scmp.lt.s32.totalorder %s759_s25, %s759_s25 }
 0x232   :  { %v559_v1 = vmul.f32 %v748_v60, %v841_v5 }
 0x233   :  { %688 = vset.pattern.permute.xlu1 %v794_v14  ;;  %p766_p3 = por %p765_p2, %p764_p1 }
 0x234   :  { %567 = vperm.xlu1 %688, %v556_v58  }
 0x235   :  { %p767_p4 = pnand %p766_p3, %p760_p0 }
 0x238   :  { %572 = vperm.xlu1 %688, %v557_v31   ;;  %v608_v31 = vadd.s32 16, %v901_v26 }
 0x23c   :  { %582 = vperm.xlu1 %688, %v559_v1  }
 0x261   :  { %v213_v62 = vpop.permute.xlu1 %212 }
 0x262   :  { %v235_v4 = vmul.f32 %v1043_v40, %v213_v62 }
 0x264   :  { %v240_v5 = vadd.f32 %v235_v4, %v50_v0 }
 0x265   :  { %v223_v2 = vpop.permute.xlu1 %222 }
 0x266   :  { %v218_v20 = vpop.permute.xlu0 %217 }
 0x267   :  { %v236_v40 = vmul.f32 %v1049_v41, %v218_v20 }
 0x269   :  { %v241_v61 = vadd.f32 %v236_v40, %v51_v15 }
 0x26a   :  { %v228_v52 = vpop.permute.xlu1 %227 }
 0x26b   :  { %v238_v28 = vmul.f32 %v1055_v27, %v228_v52  ;;  %v613_v52 = vand.u32 1, %v608_v31 }
 0x26d   :  { %v243_v29 = vadd.f32 %v238_v28, %v53_v11  ;;  %vm618_vm6 = vcmp.eq.s32.totalorder %v613_v52, 0 }
 0x26e   :  { %v233_v34 = vpop.permute.xlu1 %232 }
 0x289   :  { %v388_v8 = vpop.permute.xlu1 %387 }
 0x28a   :  { %v410_v21 = vmul.f32 %v1065_v56, %v388_v8 }
 0x28c   :  { %v415_v38 = vadd.f32 %v410_v21, %v240_v5 }
 0x2a2   :  { %v393_v9 = vpop.permute.xlu1 %392 }
 0x2a3   :  { %v411_v56 = vmul.f32 %v1080_v46, %v393_v9  ;;  %v239_v46 = vmul.f32 %v1057_v36, %v233_v34  ;;  %v610_v34 = vadd.s32 32, %v901_v26 }
 0x2a5   :  { %v416_v41 = vadd.f32 %v411_v56, %v241_v61 }
 0x2a6   :  { %v398_v14 = vpop.permute.xlu1 %397 }
 0x2a7   :  { %v412_v54 = vmul.f32 %v1069_v59, %v398_v14 }
 0x2aa   :  { %v403_v22 = vpop.permute.xlu1 %402 }
 0x2ab   :  { %v563_v30 = vpop.permute.xlu0 %562  ;;  %v413_v23 = vmul.f32 %v1087_v39, %v403_v22  ;;  %v52_v39 = vmul.f32 %v647_v3, %v893_v16 }
 0x2ac   :  { %v585_v33 = vmul.f32 %v1093_v57, %v563_v30  ;;  %v237_v57 = vmul.f32 %v1047_v63, %v223_v2  ;;  %v609_v63 = vadd.s32 24, %v901_v26 }
 0x2ad   :  { %v418_v27 = vadd.f32 %v413_v23, %v243_v29 }
 0x2ae   :  { %v590_v32 = vadd.f32 %v585_v33, %v415_v38  ;;  %v408_v43 = vpop.permute.xlu1 %407  ;;  %v242_v17 = vadd.f32 %v237_v57, %v52_v39  ;;  %v614_v53 = vand.u32 1, %v609_v63 }
 0x2af   :  { %v578_v35 = vpop.permute.xlu0 %577  ;;  %v414_v16 = vmul.f32 %v1085_v37, %v408_v43  ;;  %v612_v37 = vand.u32 1, %v607_v50 }
 0x2b0   :  { %749 = vlog2.f32 %v590_v32  ;;  %v588_v24 = vmul.f32 %v1103_v42, %v578_v35  ;;  %v54_v42 = vmul.f32 %v647_v3, %v899_v19  ;;  %v417_v45 = vadd.f32 %v412_v54, %v242_v17 }
 0x2b1   :  { %vm619_vm4 = vcmp.eq.s32.totalorder %v614_v53, 0  ;;  %vm617_vm5 = vcmp.eq.s32.totalorder %v612_v37, 0  ;;  %v615_v3 = vand.u32 1, %v610_v34 }
 0x2b2   :  { %v593_v18 = vadd.f32 %v588_v24, %v418_v27 }
 0x2b3   :  { %v568_v7 = vpop.permute.xlu1 %567  ;;  %vm620_vm7 = vcmp.eq.s32.totalorder %v615_v3, 0 }
 0x2b4   :  { %v586_v25 = vmul.f32 %v1095_v6, %v568_v7  ;;  %751 = vlog2.f32 %v593_v18  ;;  %v244_v6 = vadd.f32 %v239_v46, %v54_v42 }
 0x2b6   :  { %v591_v13 = vadd.f32 %v586_v25, %v416_v41  ;;  %v419_v58 = vadd.f32 %v414_v16, %v244_v6 }
 0x2b7   :  { %v573_v44 = vpop.permute.xlu1 %572 }
 0x2b8   :  { %753 = vlog2.f32 %v591_v13  ;;  %v587_v59 = vmul.f32 %v1101_v12, %v573_v44 }
 0x2ba   :  { %v750_v49 = vpop.eup %749  ;;  %v592_v36 = vadd.f32 %v587_v59, %v417_v45 }
 0x2bb   :  { %v596_v51 = vmul.f32 0.6931472, %v750_v49  ;;  %v583_v55 = vpop.permute.xlu1 %582 }
 0x2bc   :  { %755 = vlog2.f32 %v592_v36  ;;  %v589_v19 = vmul.f32 %v1109_v48, %v583_v55 }
 0x2bd   :  { %v621_v47 = vsel %vm616_vm3, -2.7725887, %v596_v51 }
 0x2be   :  { %626 = vst.msk [vmem:[#allocation2] sm:$0xff] %vm154_vm2, %v621_v47  ;;  %v594_v12 = vadd.f32 %v589_v19, %v419_v58  ;;  %v752_v60 = vpop.eup %751 }
 0x2bf   :  { %v602_v1 = vmul.f32 0.6931472, %v752_v60 }
 0x2c0   :  { %757 = vlog2.f32 %v594_v12 }
 0x2c1   :  { %v624_v2 = vsel %vm619_vm4, -2.7725887, %v602_v1 }
 0x2c2   :  { %v754_v62 = vpop.eup %753  ;;  %629 = vst.msk [vmem:[#allocation2 + $0x18] sm:$0xff] %vm154_vm2, %v624_v2 }
 0x2c3   :  { %v598_v48 = vmul.f32 0.6931472, %v754_v62 }
 0x2c5   :  { %v622_v8 = vsel %vm617_vm5, -2.7725887, %v598_v48 }
 0x2c6   :  { %v756_v9 = vpop.eup %755  ;;  %627 = vst.msk [vmem:[#allocation2 + $0x8] sm:$0xff] %vm154_vm2, %v622_v8 }
 0x2c7   :  { %v600_v4 = vmul.f32 0.6931472, %v756_v9 }
 0x2c9   :  { %v623_v14 = vsel %vm618_vm6, -2.7725887, %v600_v4 }
 0x2ca   :  { %v758_v20 = vpop.eup %757  ;;  %628 = vst.msk [vmem:[#allocation2 + $0x10] sm:$0xff] %vm154_vm2, %v623_v14 }
 0x2cb   :  { %v604_v0 = vmul.f32 0.6931472, %v758_v20 }
 0x2cd   :  { %v625_v26 = vsel %vm620_vm7, -2.7725887, %v604_v0 }
 0x2ce   :  { %630 = vst.msk [vmem:[#allocation2 + $0x20] sm:$0xff] %vm154_vm2, %v625_v26 }
 0x2cf   :  { %770 = shalt.err (!%p767_p4)
}
 0x2d0   :  { %s771_s28 = scalar_lea.hbm %s1175_s2, 640 }
 0x2d1   :  { %p772_p5 = scmp.ne.s32.totalorder %s1175_s2, %s771_s28  ;;  %p775_p6 = scmp.lt.u32.totalorder %s771_s28, %s1175_s2 }
 0x2d3   :  { %p777_p7 = pnand %p775_p6, %p772_p5 }
 0x2d5   :  { %780 = shalt.err (!%p777_p7)
}
 0x2d6   :  { %s797_s5 = smov 128   ;;  %s798_s6 = smov 8  }
 0x2d7   :  { %642 = dma.vmem_to_hbm [thread:$0]  %s637_s24, 640, %s1175_s2, [#allocation3], %s797_s5, %s797_s5, %s798_s6  }
 0x2d8   :  { %781 = dma.done.wait [#allocation3], 640  }
 0x2d9   :  { %782 = vsyncadd [#allocation3], 4294966656 }
 0x2da   :  { %646 = vsyncpa [#allocation3], 1 }

</bundles_post_ra>
